<compile_context>
chip_gen: v6e
topology: v6e:2x2x1
jax: 0.10.0
libtpu: 0.0.40
codegen_flags: <defaults>
</compile_context>

<pallas_src>
import jax
import jax.numpy as jnp
from jax.experimental import pallas as pl
from jax.experimental.pallas import tpu as pltpu


def _round_up(x, m):
    return ((x + m - 1) // m) * m


def _pooler_kernel(x_ref, wt_ref, b_ref, out_ref):
    # x_ref  : (tb, H_in)   CLS-token activations for this batch tile
    # wt_ref : (H_in, tn)   pre-transposed weight tile (W.T)
    # b_ref  : (1, tn)      bias tile (f32)
    # out_ref: (tb, tn)
    y = jnp.dot(x_ref[...], wt_ref[...], preferred_element_type=jnp.float32)
    y = y + b_ref[...].astype(jnp.float32)
    out_ref[...] = jnp.tanh(y).astype(out_ref.dtype)


def _pick_tb(B):
    """Batch tile: sublane-legal, large enough to amortize the ~0.35us/step overhead,
    and split >=2-way when possible so both v7x TensorCores get work."""
    tb = min(512, _round_up(B, 8))
    if tb >= B:                      # a single tile would cover the whole batch
        if B >= 16:
            tb = _round_up(pl.cdiv(B, 2), 8)   # 2-way split for megacore
            if tb >= B:
                tb = B                          # e.g. B in (9..15): full-dim block
        else:
            tb = B                              # tiny batch: full-dim block (legal)
    return tb


def _pick_tn(H_out, H_in, w_bytes, n_batch_blocks):
    """H_out tile: whole by default; tiled (multiple of 128) only when a single weight
    tile would not fit comfortably in VMEM (v7x has 64 MiB), plus a 2-way split when
    the grid would otherwise have a single step (keeps v7x's 2nd core busy)."""
    tn = H_out
    max_w_tile_bytes = 16 * 1024 * 1024
    if H_in * tn * w_bytes > max_w_tile_bytes and H_out % 128 == 0:
        tn = max(128, ((max_w_tile_bytes // (H_in * w_bytes)) // 128) * 128)
    if n_batch_blocks * pl.cdiv(H_out, tn) == 1 and H_out % 256 == 0:
        tn = H_out // 2
    return tn


def bert_pooler(hidden_states, weight, bias, *, use_bf16_compute=False):
    """hidden_states: (B, S, H); weight: PyTorch nn.Linear layout (H_out, H_in);
    bias: (H_out,). Returns tanh(hidden_states[:, 0] @ weight.T + bias)."""
    B, S, H = hidden_states.shape
    H_out, H_in = weight.shape
    assert H_in == H
    out_dtype = hidden_states.dtype

    # CLS slice stays a plain XLA slice; allow_input_fusion lets it fuse into the
    # pallas custom call so the activations traverse HBM once, not three times.
    cls = hidden_states[:, 0, :]                     # (B, H_in)
    # Transpose the PyTorch (H_out, H_in) weight once here (cheap O(H^2) pass) so the
    # kernel never re-transposes the grid-invariant weight tile per grid step.
    w_t = weight.T                                   # (H_in, H_out)
    if use_bf16_compute:                             # halves weight HBM traffic
        cls = cls.astype(jnp.bfloat16)
        w_t = w_t.astype(jnp.bfloat16)
    b2d = bias.reshape(1, H_out).astype(jnp.float32)

    x_bytes = jnp.dtype(cls.dtype).itemsize
    w_bytes = jnp.dtype(w_t.dtype).itemsize
    o_bytes = jnp.dtype(out_dtype).itemsize

    tb = _pick_tb(B)
    nb = pl.cdiv(B, tb)
    tn = _pick_tn(H_out, H_in, w_bytes, nb)
    nn = pl.cdiv(H_out, tn)
    grid = (nb, nn)                                  # both axes "parallel"

    # Weight/bias blocks are grid-invariant when H_out is not tiled -> single buffer.
    invariant = nn == 1

    # VMEM budget: double-buffered activation/output tiles + weight/bias buffers.
    wbufs = 1 if invariant else 2
    need = (2 * tb * H_in * x_bytes
            + 2 * tb * tn * o_bytes
            + wbufs * H_in * tn * w_bytes
            + wbufs * 8 * tn * 4)
    try:
        phys_vmem = pltpu.get_tpu_info().vmem_capacity_bytes
    except Exception:
        phys_vmem = 64 * 1024 * 1024                 # v7x per-TC VMEM (smallest gen)
    vmem_limit = max(32 * 1024 * 1024, need * 3 // 2)
    vmem_limit = int(min(vmem_limit, phys_vmem - 8 * 1024 * 1024))

    cost = pl.CostEstimate(
        flops=2 * B * H_in * H_out,
        transcendentals=B * H_out,
        bytes_accessed=(B * H_in * x_bytes + H_in * H_out * w_bytes
                        + H_out * 4 + B * H_out * o_bytes),
    )

    def _call(pipeline_mode):
        return pl.pallas_call(
            _pooler_kernel,
            out_shape=jax.ShapeDtypeStruct((B, H_out), out_dtype),
            grid_spec=pl.GridSpec(
                grid=grid,
                in_specs=[
                    pl.BlockSpec((tb, H_in), lambda i, j: (i, 0)),       # CLS (pipelined)
                    pl.BlockSpec((H_in, tn), lambda i, j: (0, j),
                                 pipeline_mode=pipeline_mode),           # W.T
                    pl.BlockSpec((1, tn), lambda i, j: (0, j),
                                 pipeline_mode=pipeline_mode),           # bias
                ],
                out_specs=pl.BlockSpec((tb, tn), lambda i, j: (i, j)),
            ),
            compiler_params=pltpu.CompilerParams(
                dimension_semantics=("parallel", "parallel"),            # megacore on v7x
                vmem_limit_bytes=vmem_limit,
                allow_input_fusion=[True, False, False],                 # fuse CLS slice
            ),
            cost_estimate=cost,
        )(cls, w_t, b2d)

    if invariant:
        try:
            return _call(pl.Buffered(1))   # single-buffer grid-invariant weight/bias
        except Exception:
            # TODO(synk): drop this fallback once single-buffered BlockSpecs are
            # guaranteed on all deployed JAX versions; costs one extra weight tile.
            pass
    return _call(None)


if __name__ == "__main__":
    B, S, H = 2, 8, 32
    key = jax.random.PRNGKey(0)
    k_hs, k_w, k_b = jax.random.split(key, 3)

    hidden_states = jax.random.normal(k_hs, (B, S, H), dtype=jnp.float32)
    # Deterministic parameter init (mimicking nn.Linear's uniform init range).
    bound = 1.0 / (H ** 0.5)
    weight = jax.random.uniform(k_w, (H, H), minval=-bound, maxval=bound,
                                dtype=jnp.float32)
    bias = jax.random.uniform(k_b, (H,), minval=-bound, maxval=bound,
                              dtype=jnp.float32)

    out = bert_pooler(hidden_states, weight, bias)
    out = jax.block_until_ready(out)

    # Reference check in plain JAX (same math as the PyTorch module).
    ref = jnp.tanh(hidden_states[:, 0] @ weight.T + bias)
    assert out.shape == (B, H)
    assert jnp.allclose(out, ref, atol=1e-5, rtol=1e-5)

    print("KERNEL_OK")
</pallas_src>

<mosaic_0001>
module attributes {stable_mosaic.version = 11 : i64} {
  func.func @_pooler_kernel(%arg0: i32, %arg1: i32, %arg2: memref<2x32xf32, #tpu.memory_space<vmem>>, %arg3: memref<32x32xf32, #tpu.memory_space<vmem>>, %arg4: memref<1x32xf32, #tpu.memory_space<vmem>>, %arg5: memref<2x32xf32, #tpu.memory_space<vmem>>) attributes {dimension_semantics = [#tpu.dimension_semantics<parallel>, #tpu.dimension_semantics<parallel>], iteration_bounds = array<i64: 1, 1>, scalar_prefetch = 0 : i64, scratch_operands = 0 : i64, tpu.core_type = #tpu.core_type<tc>, window_params = [{transform_indices = @transform_0, window_bounds = array<i64: 2, 32>}, {pipeline_mode = #tpu.pipeline_mode<synchronous>, transform_indices = @transform_1, window_bounds = array<i64: 32, 32>}, {pipeline_mode = #tpu.pipeline_mode<synchronous>, transform_indices = @transform_2, window_bounds = array<i64: 1, 32>}, {transform_indices = @transform_3, window_bounds = array<i64: 2, 32>}]} {
    %c0 = arith.constant 0 : index
    %c0_0 = arith.constant 0 : index
    %0 = vector.load %arg2[%c0, %c0_0] : memref<2x32xf32, #tpu.memory_space<vmem>>, vector<2x32xf32>
    %c0_1 = arith.constant 0 : index
    %c0_2 = arith.constant 0 : index
    %1 = vector.load %arg3[%c0_1, %c0_2] : memref<32x32xf32, #tpu.memory_space<vmem>>, vector<32x32xf32>
    %cst = arith.constant dense<0.000000e+00> : vector<2x32xf32>
    %2 = tpu.matmul %0, %1, %cst {dimension_numbers = #tpu.dot_dimension_numbers<[1], [0], [0], [1], [0, 0, 1, 1], [], []>} : vector<2x32xf32>, vector<32x32xf32>, vector<2x32xf32> -> vector<2x32xf32>
    %c0_3 = arith.constant 0 : index
    %c0_4 = arith.constant 0 : index
    %3 = vector.load %arg4[%c0_3, %c0_4] : memref<1x32xf32, #tpu.memory_space<vmem>>, vector<1x32xf32>
    %4 = vector.broadcast %3 : vector<1x32xf32> to vector<2x32xf32>
    %5 = arith.addf %2, %4 : vector<2x32xf32>
    %6 = math.tanh %5 : vector<2x32xf32>
    %c0_5 = arith.constant 0 : index
    %c0_6 = arith.constant 0 : index
    %7 = vector.load %arg5[%c0_5, %c0_6] : memref<2x32xf32, #tpu.memory_space<vmem>>, vector<2x32xf32>
    tpu.vector_store %arg5[%c0_5, %c0_6], %6 {strides = array<i32>} : memref<2x32xf32, #tpu.memory_space<vmem>>, vector<2x32xf32>,
    return
  }
  func.func @transform_0(%arg0: i32, %arg1: i32) -> (i32, i32) {
    %c0_i32 = arith.constant 0 : i32
    %c0_i32_0 = arith.constant 0 : i32
    return %arg0, %c0_i32 : i32, i32
  }
  func.func @transform_1(%arg0: i32, %arg1: i32) -> (i32, i32) {
    %c0_i32 = arith.constant 0 : i32
    %c0_i32_0 = arith.constant 0 : i32
    return %c0_i32, %arg1 : i32, i32
  }
  func.func @transform_2(%arg0: i32, %arg1: i32) -> (i32, i32) {
    %c0_i32 = arith.constant 0 : i32
    %c0_i32_0 = arith.constant 0 : i32
    return %c0_i32, %arg1 : i32, i32
  }
  func.func @transform_3(%arg0: i32, %arg1: i32) -> (i32, i32) {
    %c0_i32 = arith.constant 0 : i32
    return %arg0, %arg1 : i32, i32
  }
}

module attributes {stable_mosaic.version = 11 : i64} {
  func.func @_pooler_kernel(%arg0: i32, %arg1: i32, %arg2: memref<2x32xf32, #tpu.memory_space<vmem>>, %arg3: memref<32x32xf32, #tpu.memory_space<vmem>>, %arg4: memref<1x32xf32, #tpu.memory_space<vmem>>, %arg5: memref<2x32xf32, #tpu.memory_space<vmem>>) attributes {dimension_semantics = [#tpu.dimension_semantics<parallel>, #tpu.dimension_semantics<parallel>], iteration_bounds = array<i64: 1, 1>, scalar_prefetch = 0 : i64, scratch_operands = 0 : i64, tpu.core_type = #tpu.core_type<tc>, window_params = [{transform_indices = @transform_0, window_bounds = array<i64: 2, 32>}, {transform_indices = @transform_1, window_bounds = array<i64: 32, 32>}, {transform_indices = @transform_2, window_bounds = array<i64: 1, 32>}, {transform_indices = @transform_3, window_bounds = array<i64: 2, 32>}]} {
    %c0 = arith.constant 0 : index
    %c0_0 = arith.constant 0 : index
    %0 = vector.load %arg2[%c0, %c0_0] : memref<2x32xf32, #tpu.memory_space<vmem>>, vector<2x32xf32>
    %c0_1 = arith.constant 0 : index
    %c0_2 = arith.constant 0 : index
    %1 = vector.load %arg3[%c0_1, %c0_2] : memref<32x32xf32, #tpu.memory_space<vmem>>, vector<32x32xf32>
    %cst = arith.constant dense<0.000000e+00> : vector<2x32xf32>
    %2 = tpu.matmul %0, %1, %cst {dimension_numbers = #tpu.dot_dimension_numbers<[1], [0], [0], [1], [0, 0, 1, 1], [], []>} : vector<2x32xf32>, vector<32x32xf32>, vector<2x32xf32> -> vector<2x32xf32>
    %c0_3 = arith.constant 0 : index
    %c0_4 = arith.constant 0 : index
    %3 = vector.load %arg4[%c0_3, %c0_4] : memref<1x32xf32, #tpu.memory_space<vmem>>, vector<1x32xf32>
    %4 = vector.broadcast %3 : vector<1x32xf32> to vector<2x32xf32>
    %5 = arith.addf %2, %4 : vector<2x32xf32>
    %6 = math.tanh %5 : vector<2x32xf32>
    %c0_5 = arith.constant 0 : index
    %c0_6 = arith.constant 0 : index
    %7 = vector.load %arg5[%c0_5, %c0_6] : memref<2x32xf32, #tpu.memory_space<vmem>>, vector<2x32xf32>
    tpu.vector_store %arg5[%c0_5, %c0_6], %6 {strides = array<i32>} : memref<2x32xf32, #tpu.memory_space<vmem>>, vector<2x32xf32>,
    return
  }
  func.func @transform_0(%arg0: i32, %arg1: i32) -> (i32, i32) {
    %c0_i32 = arith.constant 0 : i32
    %c0_i32_0 = arith.constant 0 : i32
    return %arg0, %c0_i32 : i32, i32
  }
  func.func @transform_1(%arg0: i32, %arg1: i32) -> (i32, i32) {
    %c0_i32 = arith.constant 0 : i32
    %c0_i32_0 = arith.constant 0 : i32
    return %c0_i32, %arg1 : i32, i32
  }
  func.func @transform_2(%arg0: i32, %arg1: i32) -> (i32, i32) {
    %c0_i32 = arith.constant 0 : i32
    %c0_i32_0 = arith.constant 0 : i32
    return %c0_i32, %arg1 : i32, i32
  }
  func.func @transform_3(%arg0: i32, %arg1: i32) -> (i32, i32) {
    %c0_i32 = arith.constant 0 : i32
    return %arg0, %arg1 : i32, i32
  }
}

</mosaic_0001>

<bundles_post_ra>
// kernel: tpu_custom_call.1
= control target key start
LH: loop header
LB: loop body
LE: loop exit
PB: predicated region body
PF: predicated region fallthrough
CT: control target
= control target key end

     0   :  { %8 = vsyncpa [#allocation3], 0  ;;  %s278_s0 = inlined_call_operand.hbm [shape: f32[2,32], index: 0, kind: input, shape index: {}]   ;;  %s279_s1 = inlined_call_operand.hbm [shape: f32[32,32], index: 1, kind: input, shape index: {}]   ;;  %s280_s2 = inlined_call_operand.vmem [shape: f32[1,32], index: 2, kind: input, shape index: {}]   ;;  %s281_s3 = inlined_call_operand.hbm [shape: f32[2,32], index: 3, kind: output, shape index: {}]  }
   0x1   :  { %9 = vsyncpa [#allocation6], 0 }
   0x2   :  { %10 = vsyncpa [#allocation4], 0  ;;  %s239_s12 = smov [#allocation2]   ;;  %s240_s14 = smov [#allocation5]  }
   0x3   :  { %s17_s13 = sshll.u32 %s239_s12, 4  ;;  %s26_s15 = sshll.u32 %s240_s14, 4  ;;  %s18_s13 = int_to_ptr.vmem [resolvable:$true] %s17_s13  ;;  %s27_s15 = int_to_ptr.vmem [resolvable:$true] %s26_s15 }
   0x4   :  { %s181_s16 = scalar_lea.vmem %s18_s13, 32  ;;  %p186_p1 = scmp.lt.s32.totalorder %s18_s13, %s18_s13 }
   0x5   :  { %p182_p0 = scmp.ne.s32.totalorder %s18_s13, %s181_s16  ;;  %p187_p2 = scmp.lt.s32.totalorder %s181_s16, %s181_s16 }
   0x7   :  { %p188_p3 = por %p187_p2, %p186_p1 }
   0x9   :  { %p189_p4 = pnand %p188_p3, %p182_p0 }
   0xb   :  { %192 = shalt.err (!%p189_p4)
}
   0xc   :  { %20 = dma.hbm_to_vmem [thread:$0]  %s278_s0, 32, %s18_s13, [#allocation3]  }
   0xd   :  { %s201_s19 = scalar_lea.vmem %s27_s15, 512  ;;  %p206_p6 = scmp.lt.s32.totalorder %s27_s15, %s27_s15 }
   0xe   :  { %p202_p5 = scmp.ne.s32.totalorder %s27_s15, %s201_s19  ;;  %p207_p7 = scmp.lt.s32.totalorder %s201_s19, %s201_s19 }
  0x10   :  { %p208_p8 = por %p207_p7, %p206_p6 }
  0x12   :  { %p209_p9 = pnand %p208_p8, %p202_p5 }
  0x14   :  { %212 = shalt.err (!%p209_p9)
}
  0x15   :  { %s241_s20 = smov 128   ;;  %s242_s21 = smov 8  }
  0x16   :  { %32 = dma.hbm_to_vmem [thread:$0]  %s279_s1, 512, %s27_s15, [#allocation6], %s241_s20, %s241_s20, %s242_s21  }
  0x17   :  { %233 = dma.done.wait [#allocation3], 32  }
  0x18   :  { %234 = vsyncadd [#allocation3], 4294967264 }
  0x19   :  { %235 = dma.done.wait [#allocation6], 512  }
  0x1a   :  { %236 = vsyncadd [#allocation6], 4294966784  ;;  %v243_v0 = vmov 0.0   ;;  %vm244_vm0 = vmmov 0   ;;  %v45_v1 = vld [vmem:[#allocation5 + $0x18] sm:$0xff]  ;;  %v44_v2 = vld [vmem:[#allocation5 + $0x10] sm:$0xff] }
  0x1b   :  { %153 = vmatprep.subr.mxu0 %v243_v0  ;;  %161 = vmatprep.mubr.msk.f32.mxu0 %vm244_vm0, %v243_v0  ;;  %v43_v3 = vld [vmem:[#allocation5 + $0x8] sm:$0xff]  ;;  %v42_v4 = vld [vmem:[#allocation5] sm:$0xff]  ;;  %v41_v5 = vld [vmem:[#allocation2] sm:$0x3]  ;;  %vm53_vm1 = vcmask 261120   ;;  %s245_s24 = smov [#allocation7]  }
  0x1c   :  { %154 = vmatpush3.msra.mxu0 %v45_v1  ;;  %v146_v6 = vld [vmem:[%s280_s2] ss:$0 sm:$0xff]  ;;  %s136_s25 = sshll.u32 %s245_s24, 4  ;;  %vm128_vm2 = vcmask 254976   ;;  %s137_s25 = int_to_ptr.vmem [resolvable:$true] %s136_s25 }
  0x1d   :  { %155 = vmatprep.subr.mxu0 %v243_v0  ;;  %s213_s26 = scalar_lea.vmem %s137_s25, 32  ;;  %p218_p11 = scmp.lt.s32.totalorder %s137_s25, %s137_s25 }
  0x1e   :  { %156 = vmatpush3.msra.mxu0 %v44_v2  ;;  %p214_p10 = scmp.ne.s32.totalorder %s137_s25, %s213_s26  ;;  %p219_p12 = scmp.lt.s32.totalorder %s213_s26, %s213_s26 }
  0x1f   :  { %157 = vmatprep.subr.mxu0 %v243_v0 }
  0x20   :  { %158 = vmatpush3.msra.mxu0 %v43_v3  ;;  %p220_p13 = por %p219_p12, %p218_p11 }
  0x21   :  { %159 = vmatprep.subr.mxu0 %v243_v0 }
  0x22   :  { %160 = vmatpush3.msra.mxu0 %v42_v4  ;;  %p221_p0 = pnand %p220_p13, %p214_p10 }
  0x23   :  { %162 = vmatmul.mubr.msk.f32.vlgmr.msra.gmra.mxu0 %vm53_vm1, %v41_v5 }
  0xe3   :  { %v123_v7 = vpop.f32.mrf.mxu0 }
  0xe4   :  { %v124_v8 = vadd.f32 %v146_v6, %v123_v7 }
  0xe5   :  { %v163_v9 = vpop.f32.mrf.mxu0 }
  0xe6   :  { %171 = vtanh.f32 %v124_v8 }
  0xf3   :  { %v172_v10 = vpop.eup %171 }
  0xf4   :  { %129 = vst.msk [vmem:[#allocation7] sm:$0x3] %vm128_vm2, %v172_v10 }
  0xf5   :  { %224 = shalt.err (!%p221_p0)
}
  0xf6   :  { %139 = dma.vmem_to_hbm [thread:$0]  %s137_s25, 32, %s281_s3, [#allocation4]  }
  0xf7   :  { %237 = dma.done.wait [#allocation4], 32  }
  0xf8   :  { %238 = vsyncadd [#allocation4], 4294967264 }
  0xf9   :  { %143 = vsyncpa [#allocation3], 1 }
  0xfa   :  { %144 = vsyncpa [#allocation6], 1 }
  0xfb   :  { %145 = vsyncpa [#allocation4], 1 }

// kernel: tpu_custom_call.1
= control target key start
LH: loop header
LB: loop body
LE: loop exit
PB: predicated region body
PF: predicated region fallthrough
CT: control target
= control target key end

     0   :  { %8 = vsyncpa [#allocation3], 0  ;;  %s278_s0 = inlined_call_operand.hbm [shape: f32[2,32], index: 0, kind: input, shape index: {}]   ;;  %s279_s1 = inlined_call_operand.hbm [shape: f32[32,32], index: 1, kind: input, shape index: {}]   ;;  %s280_s2 = inlined_call_operand.vmem [shape: f32[1,32], index: 2, kind: input, shape index: {}]   ;;  %s281_s3 = inlined_call_operand.hbm [shape: f32[2,32], index: 3, kind: output, shape index: {}]  }
   0x1   :  { %9 = vsyncpa [#allocation6], 0 }
   0x2   :  { %10 = vsyncpa [#allocation4], 0  ;;  %s239_s12 = smov [#allocation2]   ;;  %s240_s14 = smov [#allocation5]  }
   0x3   :  { %s17_s13 = sshll.u32 %s239_s12, 4  ;;  %s26_s15 = sshll.u32 %s240_s14, 4  ;;  %s18_s13 = int_to_ptr.vmem [resolvable:$true] %s17_s13  ;;  %s27_s15 = int_to_ptr.vmem [resolvable:$true] %s26_s15 }
   0x4   :  { %s181_s16 = scalar_lea.vmem %s18_s13, 32  ;;  %p186_p1 = scmp.lt.s32.totalorder %s18_s13, %s18_s13 }
   0x5   :  { %p182_p0 = scmp.ne.s32.totalorder %s18_s13, %s181_s16  ;;  %p187_p2 = scmp.lt.s32.totalorder %s181_s16, %s181_s16 }
   0x7   :  { %p188_p3 = por %p187_p2, %p186_p1 }
   0x9   :  { %p189_p4 = pnand %p188_p3, %p182_p0 }
   0xb   :  { %192 = shalt.err (!%p189_p4)
}
   0xc   :  { %20 = dma.hbm_to_vmem [thread:$0]  %s278_s0, 32, %s18_s13, [#allocation3]  }
   0xd   :  { %s201_s19 = scalar_lea.vmem %s27_s15, 512  ;;  %p206_p6 = scmp.lt.s32.totalorder %s27_s15, %s27_s15 }
   0xe   :  { %p202_p5 = scmp.ne.s32.totalorder %s27_s15, %s201_s19  ;;  %p207_p7 = scmp.lt.s32.totalorder %s201_s19, %s201_s19 }
  0x10   :  { %p208_p8 = por %p207_p7, %p206_p6 }
  0x12   :  { %p209_p9 = pnand %p208_p8, %p202_p5 }
  0x14   :  { %212 = shalt.err (!%p209_p9)
}
  0x15   :  { %s241_s20 = smov 128   ;;  %s242_s21 = smov 8  }
  0x16   :  { %32 = dma.hbm_to_vmem [thread:$0]  %s279_s1, 512, %s27_s15, [#allocation6], %s241_s20, %s241_s20, %s242_s21  }
  0x17   :  { %233 = dma.done.wait [#allocation3], 32  }
  0x18   :  { %234 = vsyncadd [#allocation3], 4294967264 }
  0x19   :  { %235 = dma.done.wait [#allocation6], 512  }
  0x1a   :  { %236 = vsyncadd [#allocation6], 4294966784  ;;  %v243_v0 = vmov 0.0   ;;  %vm244_vm0 = vmmov 0   ;;  %v45_v1 = vld [vmem:[#allocation5 + $0x18] sm:$0xff]  ;;  %v44_v2 = vld [vmem:[#allocation5 + $0x10] sm:$0xff] }
  0x1b   :  { %153 = vmatprep.subr.mxu0 %v243_v0  ;;  %161 = vmatprep.mubr.msk.f32.mxu0 %vm244_vm0, %v243_v0  ;;  %v43_v3 = vld [vmem:[#allocation5 + $0x8] sm:$0xff]  ;;  %v42_v4 = vld [vmem:[#allocation5] sm:$0xff]  ;;  %v41_v5 = vld [vmem:[#allocation2] sm:$0x3]  ;;  %vm53_vm1 = vcmask 261120   ;;  %s245_s24 = smov [#allocation7]  }
  0x1c   :  { %154 = vmatpush3.msra.mxu0 %v45_v1  ;;  %v146_v6 = vld [vmem:[%s280_s2] ss:$0 sm:$0xff]  ;;  %s136_s25 = sshll.u32 %s245_s24, 4  ;;  %vm128_vm2 = vcmask 254976   ;;  %s137_s25 = int_to_ptr.vmem [resolvable:$true] %s136_s25 }
  0x1d   :  { %155 = vmatprep.subr.mxu0 %v243_v0  ;;  %s213_s26 = scalar_lea.vmem %s137_s25, 32  ;;  %p218_p11 = scmp.lt.s32.totalorder %s137_s25, %s137_s25 }
  0x1e   :  { %156 = vmatpush3.msra.mxu0 %v44_v2  ;;  %p214_p10 = scmp.ne.s32.totalorder %s137_s25, %s213_s26  ;;  %p219_p12 = scmp.lt.s32.totalorder %s213_s26, %s213_s26 }
  0x1f   :  { %157 = vmatprep.subr.mxu0 %v243_v0 }
  0x20   :  { %158 = vmatpush3.msra.mxu0 %v43_v3  ;;  %p220_p13 = por %p219_p12, %p218_p11 }
  0x21   :  { %159 = vmatprep.subr.mxu0 %v243_v0 }
  0x22   :  { %160 = vmatpush3.msra.mxu0 %v42_v4  ;;  %p221_p0 = pnand %p220_p13, %p214_p10 }
  0x23   :  { %162 = vmatmul.mubr.msk.f32.vlgmr.msra.gmra.mxu0 %vm53_vm1, %v41_v5 }
  0xe3   :  { %v123_v7 = vpop.f32.mrf.mxu0 }
  0xe4   :  { %v124_v8 = vadd.f32 %v146_v6, %v123_v7 }
  0xe5   :  { %v163_v9 = vpop.f32.mrf.mxu0 }
  0xe6   :  { %171 = vtanh.f32 %v124_v8 }
  0xf3   :  { %v172_v10 = vpop.eup %171 }
  0xf4   :  { %129 = vst.msk [vmem:[#allocation7] sm:$0x3] %vm128_vm2, %v172_v10 }
  0xf5   :  { %224 = shalt.err (!%p221_p0)
}
  0xf6   :  { %139 = dma.vmem_to_hbm [thread:$0]  %s137_s25, 32, %s281_s3, [#allocation4]  }
  0xf7   :  { %237 = dma.done.wait [#allocation4], 32  }
  0xf8   :  { %238 = vsyncadd [#allocation4], 4294967264 }
  0xf9   :  { %143 = vsyncpa [#allocation3], 1 }
  0xfa   :  { %144 = vsyncpa [#allocation6], 1 }
  0xfb   :  { %145 = vsyncpa [#allocation4], 1 }

</bundles_post_ra>
